<compile_context>
chip_gen: v5e
topology: v5e:2x2
jax: 0.10.0
libtpu: 0.0.40
codegen_flags: <defaults>
</compile_context>

<pallas_src>
import numpy as np
import jax
import jax.numpy as jnp
from jax import lax
from jax.experimental import pallas as pl
from jax.experimental.pallas import tpu as pltpu


_BLOCK_BYTES = 2 * 1024 * 1024       # ~2 MiB per input block (x2 dbl-buffer, x2 in/out ~ 8 MiB)
_VMEM_LIMIT = 32 * 1024 * 1024       # explicit scoped-VMEM limit, safe on v5e/v6e/v7x


# ---------------------------------------------------------------------------
# tile-size helpers
# ---------------------------------------------------------------------------
def _sublane_multiple(dtype):
    itemsize = jnp.dtype(dtype).itemsize
    return max(8, 32 // itemsize)          # 8 for f32, 16 for bf16, 32 for 8-bit


def _pick_row_tile(R, target, multiple):
    """Row tile for a (R, L) view.  Returns (tile_rows, padded_R)."""
    if R <= target:
        return R, R                        # whole thing fits one budget-sized block
    t = max(multiple, (target // multiple) * multiple)
    min_ok = max(multiple, ((t // 8) // multiple) * multiple)
    d = t
    while d >= min_ok:                     # prefer an exact divisor: no padding copy
        if R % d == 0:
            return d, R
        d -= multiple
    return t, ((R + t - 1) // t) * t       # rare fallback: pad rows, slice afterwards


def _divisor_tile(n, target, multiple=1):
    """Largest t <= target dividing n with t % multiple == 0; falls back to n (full dim)."""
    if n <= target:
        return n
    t = max(multiple, (target // multiple) * multiple)
    while t >= multiple:
        if n % t == 0:
            return t
        t -= multiple
    return n


# ---------------------------------------------------------------------------
# Kernel 1: on-the-fly RMS normalization over the last axis
#   x / sqrt(mean(|x|^2, -1, keepdims))  ==  x * rsqrt(mean(x*x, -1, keepdims))
# ---------------------------------------------------------------------------
def _rms_norm_kernel(x_ref, o_ref):
    x = x_ref[...].astype(jnp.float32)
    ms = jnp.mean(x * x, axis=-1, keepdims=True)   # (tr, 1), f32 accumulate
    inv = lax.rsqrt(ms)                            # EUP slot; avoids full-tile divide
    o_ref[...] = (x * inv).astype(o_ref.dtype)


# ---------------------------------------------------------------------------
# Kernel 2a: precomputed sigma, normalized dim is an interior/leading dim
#   x block: (TA, C, TB)   inv block: (C, 1)   -> broadcast multiply
# ---------------------------------------------------------------------------
def _scale_dim_kernel(x_ref, inv_ref, o_ref):
    o_ref[...] = x_ref[...] * inv_ref[...]


# ---------------------------------------------------------------------------
# Kernel 2b: precomputed sigma, normalized dim is the last (lane) axis
#   x block: (TR, C)       inv block: (1, C)   -> broadcast multiply along lanes
# ---------------------------------------------------------------------------
def _scale_last_kernel(x_ref, inv_ref, o_ref):
    o_ref[...] = x_ref[...] * inv_ref[...]


# ---------------------------------------------------------------------------
# Wrapper (JAX/Pallas equivalent of NormalizationLayer.forward)
# ---------------------------------------------------------------------------
def normalization_layer(x, dim, sigma, on_the_fly, *, block_bytes=_BLOCK_BYTES):
    x = jnp.asarray(x)
    itemsize = jnp.dtype(x.dtype).itemsize
    sub = _sublane_multiple(x.dtype)
    cparams_1d = pltpu.CompilerParams(
        dimension_semantics=("parallel",), vmem_limit_bytes=_VMEM_LIMIT)

    if on_the_fly:
        orig_shape = x.shape
        L = orig_shape[-1]
        R = int(np.prod(orig_shape[:-1])) if len(orig_shape) > 1 else 1
        x2 = x.reshape(R, L)
        target_rows = max(sub, block_bytes // max(1, L * itemsize))
        tr, R_pad = _pick_row_tile(R, target_rows, sub)
        if R_pad != R:
            x2 = jnp.pad(x2, ((0, R_pad - R), (0, 0)))
        out = pl.pallas_call(
            _rms_norm_kernel,
            out_shape=jax.ShapeDtypeStruct((R_pad, L), x.dtype),
            grid=(R_pad // tr,),
            in_specs=[pl.BlockSpec((tr, L), lambda i: (i, 0))],
            out_specs=pl.BlockSpec((tr, L), lambda i: (i, 0)),
            compiler_params=cparams_1d,
        )(x2)
        if R_pad != R:
            out = out[:R]
        return out.reshape(orig_shape)

    # ---- precomputed-sigma path --------------------------------------------
    # TODO(synk): torch allows sigma with extra leading broadcast dims; here we
    # support the common 1-D sigma of length x.shape[dim].
    sigma = jnp.asarray(sigma).reshape(-1)
    dim = dim % x.ndim
    C = x.shape[dim]
    assert sigma.shape[0] == C, "sigma must have length x.shape[dim]"
    inv = (1.0 / sigma.astype(jnp.float32)).astype(x.dtype)   # reciprocal once

    if dim == x.ndim - 1:
        # Normalized dim is the lane dim: flatten to (A, C) and row-tile.
        A = int(np.prod(x.shape[:-1])) if x.ndim > 1 else 1
        x2 = x.reshape(A, C)
        target_rows = max(sub, block_bytes // max(1, C * itemsize))
        tr, A_pad = _pick_row_tile(A, target_rows, sub)
        if A_pad != A:
            x2 = jnp.pad(x2, ((0, A_pad - A), (0, 0)))
        out = pl.pallas_call(
            _scale_last_kernel,
            out_shape=jax.ShapeDtypeStruct((A_pad, C), x.dtype),
            grid=(A_pad // tr,),
            in_specs=[pl.BlockSpec((tr, C), lambda i: (i, 0)),
                      pl.BlockSpec((1, C), lambda i: (0, 0))],
            out_specs=pl.BlockSpec((tr, C), lambda i: (i, 0)),
            compiler_params=cparams_1d,
        )(x2, inv.reshape(1, C))
        if A_pad != A:
            out = out[:A]
        return out.reshape(x.shape)

    # Normalized dim is interior/leading: view as (A, C, B), B is the lane dim.
    A = int(np.prod(x.shape[:dim])) if dim > 0 else 1
    B = int(np.prod(x.shape[dim + 1:]))
    x3 = x.reshape(A, C, B)
    slab = C * B * itemsize
    if slab <= block_bytes:
        TB = B
        TA = _divisor_tile(A, max(1, block_bytes // slab))
    else:
        TA = 1
        TB = _divisor_tile(B, max(128, block_bytes // max(1, C * itemsize)), multiple=128)
    out = pl.pallas_call(
        _scale_dim_kernel,
        out_shape=jax.ShapeDtypeStruct((A, C, B), x.dtype),
        grid=(A // TA, B // TB),
        in_specs=[pl.BlockSpec((TA, C, TB), lambda i, j: (i, 0, j)),
                  pl.BlockSpec((C, 1), lambda i, j: (0, 0))],
        out_specs=pl.BlockSpec((TA, C, TB), lambda i, j: (i, 0, j)),
        compiler_params=pltpu.CompilerParams(
            dimension_semantics=("parallel", "parallel"),
            vmem_limit_bytes=_VMEM_LIMIT),
    )(x3, inv.reshape(C, 1))
    return out.reshape(x.shape)


if __name__ == "__main__":
    key = jax.random.PRNGKey(0)
    kx, ks, ks2 = jax.random.split(key, 3)

    # Small deterministic inputs consistent with the module's forward.
    x = jax.random.normal(kx, (2, 4, 16, 16), dtype=jnp.float32)
    dim = 1
    sigma = jnp.abs(jax.random.normal(ks, (4,), dtype=jnp.float32)) + 0.5

    # ---- on_the_fly = True -------------------------------------------------
    out_fly = normalization_layer(x, dim, sigma, on_the_fly=True)
    out_fly = jax.block_until_ready(out_fly)
    ref_sigma = jnp.sqrt(jnp.mean(jnp.abs(x) ** 2.0, axis=-1, keepdims=True))
    ref_fly = x / ref_sigma
    assert np.allclose(np.asarray(out_fly), np.asarray(ref_fly),
                       rtol=1e-5, atol=1e-5), "on_the_fly mismatch"

    # ---- on_the_fly = False, interior dim ----------------------------------
    out_pre = normalization_layer(x, dim, sigma, on_the_fly=False)
    out_pre = jax.block_until_ready(out_pre)
    ref_pre = x / sigma[:, None, None]   # sigma[..., None, None] for dim=1, ndim=4
    assert np.allclose(np.asarray(out_pre), np.asarray(ref_pre),
                       rtol=1e-5, atol=1e-5), "precomputed-sigma mismatch (interior dim)"

    # ---- on_the_fly = False, last dim --------------------------------------
    sigma_last = jnp.abs(jax.random.normal(ks2, (16,), dtype=jnp.float32)) + 0.5
    out_last = normalization_layer(x, x.ndim - 1, sigma_last, on_the_fly=False)
    out_last = jax.block_until_ready(out_last)
    ref_last = x / sigma_last
    assert np.allclose(np.asarray(out_last), np.asarray(ref_last),
                       rtol=1e-5, atol=1e-5), "precomputed-sigma mismatch (last dim)"

    print("KERNEL_OK")
</pallas_src>

<mosaic_0001>
module attributes {stable_mosaic.version = 11 : i64} {
  func.func @_rms_norm_kernel(%arg0: i32, %arg1: memref<128x16xf32, #tpu.memory_space<vmem>>, %arg2: memref<128x16xf32, #tpu.memory_space<vmem>>) attributes {dimension_semantics = [#tpu.dimension_semantics<parallel>], iteration_bounds = array<i64: 1>, scalar_prefetch = 0 : i64, scratch_operands = 0 : i64, tpu.core_type = #tpu.core_type<tc>, window_params = [{transform_indices = @transform_0, window_bounds = array<i64: 128, 16>}, {transform_indices = @transform_1, window_bounds = array<i64: 128, 16>}]} {
    %c0 = arith.constant 0 : index
    %c0_0 = arith.constant 0 : index
    %0 = vector.load %arg1[%c0, %c0_0] : memref<128x16xf32, #tpu.memory_space<vmem>>, vector<128x16xf32>
    %1 = arith.mulf %0, %0 : vector<128x16xf32>
    %cst = arith.constant dense<0.000000e+00> : vector<128xf32>
    %2 = vector.multi_reduction <add>, %1, %cst [1] : vector<128x16xf32> to vector<128xf32>
    %3 = vector.shape_cast %2 : vector<128xf32> to vector<128x1xf32>
    %cst_1 = arith.constant 1.600000e+01 : f32
    %4 = vector.broadcast %cst_1 : f32 to vector<128x1xf32>
    %5 = arith.divf %3, %4 : vector<128x1xf32>
    %6 = math.rsqrt %5 : vector<128x1xf32>
    %7 = vector.broadcast %6 : vector<128x1xf32> to vector<128x16xf32>
    %8 = arith.mulf %0, %7 : vector<128x16xf32>
    %c0_2 = arith.constant 0 : index
    %c0_3 = arith.constant 0 : index
    %9 = vector.load %arg2[%c0_2, %c0_3] : memref<128x16xf32, #tpu.memory_space<vmem>>, vector<128x16xf32>
    tpu.vector_store %arg2[%c0_2, %c0_3], %8 {strides = array<i32>} : memref<128x16xf32, #tpu.memory_space<vmem>>, vector<128x16xf32>,
    return
  }
  func.func @transform_0(%arg0: i32) -> (i32, i32) {
    %c0_i32 = arith.constant 0 : i32
    %c0_i32_0 = arith.constant 0 : i32
    return %arg0, %c0_i32 : i32, i32
  }
  func.func @transform_1(%arg0: i32) -> (i32, i32) {
    %c0_i32 = arith.constant 0 : i32
    %c0_i32_0 = arith.constant 0 : i32
    return %arg0, %c0_i32 : i32, i32
  }
}

</mosaic_0001>

<bundles_post_ra>
// kernel: tpu_custom_call.1
= control target key start
LH: loop header
LB: loop body
LE: loop exit
PB: predicated region body
PF: predicated region fallthrough
CT: control target
= control target key end

     0   :  { %vm40_vm0 = vcmask 130048   ;;  %v343_v48 = vmov 16.0   ;;  %s698_s0 = inlined_call_operand.vmem [shape: f32[128,16], index: 0, kind: input, shape index: {}]   ;;  %s699_s1 = inlined_call_operand.vmem [shape: f32[128,16], index: 1, kind: output, shape index: {}]  }
   0x1   :  { %v357_v0 = vld [vmem:[%s698_s0 + $0x20] sm:$0xff]  ;;  %v362_v1 = vld [vmem:[%s698_s0 + $0x10] sm:$0xff]  ;;  %v378_v6 = vld [vmem:[%s698_s0 + $0x28] sm:$0xff]  ;;  %309 = vrcp.f32 %v343_v48 }
   0x2   :  { %v367_v2 = vld [vmem:[%s698_s0] sm:$0xff]  ;;  %v28_v3 = vmul.f32 %v357_v0, %v357_v0  ;;  %v26_v4 = vmul.f32 %v362_v1, %v362_v1  ;;  %v383_v7 = vld [vmem:[%s698_s0 + $0x18] sm:$0xff]  ;;  %v391_v11 = vld [vmem:[%s698_s0 + $0x8] sm:$0xff]  ;;  %v29_v12 = vmul.f32 %v378_v6, %v378_v6 }
   0x3   :  { %v24_v5 = vmul.f32 %v367_v2, %v367_v2  ;;  %v27_v13 = vmul.f32 %v383_v7, %v383_v7  ;;  %v25_v14 = vmul.f32 %v391_v11, %v391_v11  ;;  %v405_v18 = vld [vmem:[%s698_s0 + $0x40] sm:$0xff]  ;;  %v410_v19 = vld [vmem:[%s698_s0 + $0x38] sm:$0xff]  ;;  %v415_v20 = vld [vmem:[%s698_s0 + $0x30] sm:$0xff] }
   0x4   :  { %v53_v8 = vsel %vm40_vm0, %v28_v3, 0.0  ;;  %v47_v9 = vsel %vm40_vm0, %v26_v4, 0.0  ;;  %v56_v15 = vsel %vm40_vm0, %v29_v12, 0.0  ;;  %v32_v21 = vmul.f32 %v405_v18, %v405_v18  ;;  %v429_v27 = vld [vmem:[%s698_s0 + $0x58] sm:$0xff]  ;;  %v434_v28 = vld [vmem:[%s698_s0 + $0x50] sm:$0xff]  ;;  %v439_v29 = vld [vmem:[%s698_s0 + $0x48] sm:$0xff] }
   0x5   :  { %v41_v10 = vsel %vm40_vm0, %v24_v5, 0.0  ;;  %54 = vadd.xlane.f32.xlu2 %v53_v8  ;;  %48 = vadd.xlane.f32.xlu1 %v47_v9  ;;  %v50_v16 = vsel %vm40_vm0, %v27_v13, 0.0  ;;  %v44_v17 = vsel %vm40_vm0, %v25_v14, 0.0  ;;  %v31_v22 = vmul.f32 %v410_v19, %v410_v19  ;;  %v453_v36 = vld [vmem:[%s698_s0 + $0x70] sm:$0xff]  ;;  %v458_v37 = vld [vmem:[%s698_s0 + $0x68] sm:$0xff]  ;;  %v463_v38 = vld [vmem:[%s698_s0 + $0x60] sm:$0xff] }
   0x6   :  { %42 = vadd.xlane.f32.xlu0 %v41_v10  ;;  %v30_v23 = vmul.f32 %v415_v20, %v415_v20  ;;  %v65_v24 = vsel %vm40_vm0, %v32_v21, 0.0  ;;  %v35_v30 = vmul.f32 %v429_v27, %v429_v27  ;;  %v34_v31 = vmul.f32 %v434_v28, %v434_v28  ;;  %v477_v45 = vld [vmem:[%s698_s0 + $0x78] sm:$0xff] }
   0x7   :  { %v62_v25 = vsel %vm40_vm0, %v31_v22, 0.0  ;;  %v33_v32 = vmul.f32 %v439_v29, %v439_v29  ;;  %v38_v39 = vmul.f32 %v453_v36, %v453_v36  ;;  %v37_v40 = vmul.f32 %v458_v37, %v458_v37  ;;  %v310_v49 = vpop.eup %309 }
   0x8   :  { %v59_v26 = vsel %vm40_vm0, %v30_v23, 0.0  ;;  %v74_v33 = vsel %vm40_vm0, %v35_v30, 0.0  ;;  %v71_v34 = vsel %vm40_vm0, %v34_v31, 0.0  ;;  %v36_v41 = vmul.f32 %v463_v38, %v463_v38 }
   0x9   :  { %v68_v35 = vsel %vm40_vm0, %v33_v32, 0.0  ;;  %v83_v42 = vsel %vm40_vm0, %v38_v39, 0.0  ;;  %v80_v43 = vsel %vm40_vm0, %v37_v40, 0.0  ;;  %v39_v46 = vmul.f32 %v477_v45, %v477_v45 }
   0xa   :  { %v77_v44 = vsel %vm40_vm0, %v36_v41, 0.0  ;;  %v90_v50 = vmul.f32 16.0, %v310_v49  ;;  %vm94_vm1 = vweird.f32 %v310_v49 }
   0xb   :  { %v86_v47 = vsel %vm40_vm0, %v39_v46, 0.0 }
   0xc   :  { %v91_v51 = vsub.f32 1.0, %v90_v50 }
   0xd   :  { %57 = vadd.xlane.f32.xlu2 %v56_v15  ;;  %51 = vadd.xlane.f32.xlu1 %v50_v16 }
   0xe   :  { %45 = vadd.xlane.f32.xlu0 %v44_v17  ;;  %v92_v52 = vmul.f32 %v310_v49, %v91_v51 }
  0x10   :  { %v93_v53 = vadd.f32 %v310_v49, %v92_v52 }
  0x12   :  { %v482_v54 = vsel %vm94_vm1, %v310_v49, %v93_v53 }
  0x15   :  { %66 = vadd.xlane.f32.xlu2 %v65_v24  ;;  %63 = vadd.xlane.f32.xlu1 %v62_v25 }
  0x16   :  { %60 = vadd.xlane.f32.xlu0 %v59_v26 }
  0x1d   :  { %75 = vadd.xlane.f32.xlu2 %v74_v33  ;;  %72 = vadd.xlane.f32.xlu1 %v71_v34 }
  0x1e   :  { %69 = vadd.xlane.f32.xlu0 %v68_v35 }
  0x25   :  { %84 = vadd.xlane.f32.xlu2 %v83_v42  ;;  %81 = vadd.xlane.f32.xlu1 %v80_v43 }
  0x26   :  { %78 = vadd.xlane.f32.xlu0 %v77_v44 }
  0x2e   :  { %87 = vadd.xlane.f32.xlu0 %v86_v47 }
  0x78   :  { %v55_v55 = vpop.xlane.xlu2 %54  ;;  %v49_v56 = vpop.xlane.xlu1 %48 }
  0x79   :  { %v100_v57 = vmul.f32 %v482_v54, %v55_v55  ;;  %v98_v58 = vmul.f32 %v482_v54, %v49_v56  ;;  %v43_v59 = vpop.xlane.xlu0 %42 }
  0x7a   :  { %v96_v60 = vmul.f32 %v482_v54, %v43_v59 }
  0x7b   :  { %311 = vrsqrt.f32 %v100_v57  ;;  %vm158_vm2 = vweird.f32 %v100_v57  ;;  %vm138_vm4 = vweird.f32 %v98_v58 }
  0x7c   :  { %313 = vrsqrt.f32 %v98_v58  ;;  %vm118_vm6 = vweird.f32 %v96_v60 }
  0x7d   :  { %315 = vrsqrt.f32 %v96_v60 }
  0x80   :  { %v58_v61 = vpop.xlane.xlu2 %57  ;;  %v52_v62 = vpop.xlane.xlu1 %51 }
  0x81   :  { %v312_v63 = vpop.eup %311  ;;  %v488_v3 = vmul.f32 %v482_v54, %v58_v61  ;;  %v491_v4 = vmul.f32 %v482_v54, %v52_v62  ;;  %v46_v5 = vpop.xlane.xlu0 %45 }
  0x82   :  { %v314_v8 = vpop.eup %313  ;;  %v153_v9 = vmul.f32 %v312_v63, %v100_v57  ;;  %v494_v10 = vmul.f32 %v482_v54, %v46_v5  ;;  %vm159_vm3 = vweird.f32 %v312_v63 }
  0x83   :  { %v316_v12 = vpop.eup %315  ;;  %v133_v13 = vmul.f32 %v314_v8, %v98_v58  ;;  %317 = vrsqrt.f32 %v488_v3  ;;  %vm139_vm5 = vweird.f32 %v314_v8  ;;  %vm160_vm8 = vmor %vm158_vm2, %vm159_vm3  ;;  %vm168_vm11 = vweird.f32 %v488_v3 }
  0x84   :  { %v154_v14 = vmul.f32 %v312_v63, %v153_v9  ;;  %v113_v15 = vmul.f32 %v316_v12, %v96_v60  ;;  %319 = vrsqrt.f32 %v491_v4  ;;  %vm119_vm7 = vweird.f32 %v316_v12  ;;  %vm140_vm9 = vmor %vm138_vm4, %vm139_vm5 }
  0x85   :  { %v134_v16 = vmul.f32 %v314_v8, %v133_v13  ;;  %321 = vrsqrt.f32 %v494_v10  ;;  %vm120_vm10 = vmor %vm118_vm6, %vm119_vm7  ;;  %vm148_vm12 = vweird.f32 %v491_v4  ;;  %vm128_vm2 = vweird.f32 %v494_v10 }
  0x86   :  { %v155_v17 = vmul.f32 0.5, %v154_v14  ;;  %v114_v21 = vmul.f32 %v316_v12, %v113_v15 }
  0x87   :  { %v135_v22 = vmul.f32 0.5, %v134_v16 }
  0x88   :  { %v156_v23 = vsub.f32 1.5, %v155_v17  ;;  %v115_v24 = vmul.f32 0.5, %v114_v21  ;;  %v67_v25 = vpop.xlane.xlu2 %66  ;;  %v64_v26 = vpop.xlane.xlu1 %63 }
  0x89   :  { %v499_v30 = vpop.eup %317  ;;  %v136_v31 = vsub.f32 1.5, %v135_v22  ;;  %v502_v32 = vmul.f32 %v482_v54, %v67_v25  ;;  %v61_v33 = vpop.xlane.xlu0 %60  ;;  %v516_v44 = vmul.f32 %v482_v54, %v64_v26 }
  0x8a   :  { %v504_v34 = vpop.eup %319  ;;  %v157_v35 = vmul.f32 %v312_v63, %v156_v23  ;;  %v116_v39 = vsub.f32 1.5, %v115_v24  ;;  %v163_v40 = vmul.f32 %v499_v30, %v488_v3  ;;  %vm169_vm13 = vweird.f32 %v499_v30 }
  0x8b   :  { %v508_v41 = vpop.eup %321  ;;  %v137_v42 = vmul.f32 %v314_v8, %v136_v31  ;;  %v143_v43 = vmul.f32 %v504_v34, %v491_v4  ;;  %323 = vrsqrt.f32 %v502_v32  ;;  %v543_v60 = vmul.f32 %v482_v54, %v61_v33  ;;  %vm170_vm1 = vmor %vm168_vm11, %vm169_vm13 }
  0x8c   :  { %v161_v46 = vsel %vm160_vm8, %v312_v63, %v157_v35  ;;  %v117_v47 = vmul.f32 %v316_v12, %v116_v39  ;;  %v164_v48 = vmul.f32 %v499_v30, %v163_v40  ;;  %v123_v49 = vmul.f32 %v508_v41, %v494_v10 }
  0x8d   :  { %v276_v50 = vmul.f32 %v161_v46, %v357_v0  ;;  %v141_v51 = vsel %vm140_vm9, %v314_v8, %v137_v42  ;;  %v144_v52 = vmul.f32 %v504_v34, %v143_v43  ;;  %325 = vrsqrt.f32 %v516_v44 }
  0x8e   :  { %v274_v53 = vmul.f32 %v141_v51, %v362_v1  ;;  %v121_v55 = vsel %vm120_vm10, %v316_v12, %v117_v47  ;;  %v165_v56 = vmul.f32 0.5, %v164_v48  ;;  %v124_v57 = vmul.f32 %v508_v41, %v123_v49 }
  0x8f   :  { %292 = vst.msk [vmem:[%s699_s1 + $0x20] sm:$0xff] %vm40_vm0, %v276_v50  ;;  %v272_v0 = vmul.f32 %v121_v55, %v367_v2  ;;  %v145_v58 = vmul.f32 0.5, %v144_v52  ;;  %vm149_vm14 = vweird.f32 %v504_v34  ;;  %vm129_vm15 = vweird.f32 %v508_v41 }
  0x90   :  { %290 = vst.msk [vmem:[%s699_s1 + $0x10] sm:$0xff] %vm40_vm0, %v274_v53  ;;  %v166_v1 = vsub.f32 1.5, %v165_v56  ;;  %v125_v59 = vmul.f32 0.5, %v124_v57  ;;  %v76_v61 = vpop.xlane.xlu2 %75  ;;  %v73_v62 = vpop.xlane.xlu1 %72  ;;  %327 = vrsqrt.f32 %v543_v60  ;;  %vm150_vm3 = vmor %vm148_vm12, %vm149_vm14  ;;  %vm198_vm5 = vweird.f32 %v502_v32 }
  0x91   :  { %v324_v2 = vpop.eup %323  ;;  %288 = vst.msk [vmem:[%s699_s1] sm:$0xff] %vm40_vm0, %v272_v0  ;;  %v146_v63 = vsub.f32 1.5, %v145_v58  ;;  %v551_v5 = vmul.f32 %v482_v54, %v76_v61  ;;  %v554_v8 = vmul.f32 %v482_v54, %v73_v62  ;;  %v70_v9 = vpop.xlane.xlu0 %69  ;;  %vm130_vm4 = vmor %vm128_vm2, %vm129_vm15  ;;  %vm188_vm7 = vweird.f32 %v516_v44 }
  0x92   :  { %v167_v12 = vmul.f32 %v499_v30, %v166_v1  ;;  %v126_v13 = vsub.f32 1.5, %v125_v59  ;;  %v193_v14 = vmul.f32 %v324_v2, %v502_v32  ;;  %vm199_vm6 = vweird.f32 %v324_v2 }
  0x93   :  { %v147_v15 = vmul.f32 %v504_v34, %v146_v63  ;;  %329 = vrsqrt.f32 %v551_v5  ;;  %v326_v22 = vpop.eup %325  ;;  %vm200_vm8 = vmor %vm198_vm5, %vm199_vm6  ;;  %vm178_vm10 = vweird.f32 %v543_v60  ;;  %vm228_vm11 = vweird.f32 %v551_v5 }
  0x94   :  { %v171_v16 = vsel %vm170_vm1, %v499_v30, %v167_v12  ;;  %v127_v17 = vmul.f32 %v508_v41, %v126_v13  ;;  %v194_v21 = vmul.f32 %v324_v2, %v193_v14  ;;  %331 = vrsqrt.f32 %v554_v8 }
  0x95   :  { %v277_v3 = vmul.f32 %v171_v16, %v378_v6  ;;  %v151_v23 = vsel %vm150_vm3, %v504_v34, %v147_v15  ;;  %v183_v4 = vmul.f32 %v326_v22, %v516_v44  ;;  %v583_v6 = vmul.f32 %v482_v54, %v70_v9 }
  0x96   :  { %v275_v10 = vmul.f32 %v151_v23, %v383_v7  ;;  %v131_v24 = vsel %vm130_vm4, %v508_v41, %v127_v17  ;;  %v195_v25 = vmul.f32 0.5, %v194_v21  ;;  %v328_v34 = vpop.eup %327  ;;  %vm189_vm9 = vweird.f32 %v326_v22 }
  0x97   :  { %293 = vst.msk [vmem:[%s699_s1 + $0x28] sm:$0xff] %vm40_vm0, %v277_v3  ;;  %v273_v26 = vmul.f32 %v131_v24, %v391_v11  ;;  %v184_v30 = vmul.f32 %v326_v22, %v183_v4  ;;  %333 = vrsqrt.f32 %v583_v6  ;;  %v173_v43 = vmul.f32 %v328_v34, %v543_v60  ;;  %vm190_vm13 = vmor %vm188_vm7, %vm189_vm9 }
  0x98   :  { %291 = vst.msk [vmem:[%s699_s1 + $0x18] sm:$0xff] %vm40_vm0, %v275_v10  ;;  %v196_v7 = vsub.f32 1.5, %v195_v25  ;;  %v85_v31 = vpop.xlane.xlu2 %84  ;;  %v82_v33 = vpop.xlane.xlu1 %81  ;;  %vm218_vm12 = vweird.f32 %v554_v8  ;;  %vm179_vm14 = vweird.f32 %v328_v34  ;;  %vm208_vm3 = vweird.f32 %v583_v6 }
  0x99   :  { %289 = vst.msk [vmem:[%s699_s1 + $0x8] sm:$0xff] %vm40_vm0, %v273_v26  ;;  %v596_v11 = vmul.f32 %v482_v54, %v85_v31  ;;  %v599_v35 = vmul.f32 %v482_v54, %v82_v33  ;;  %v79_v39 = vpop.xlane.xlu0 %78  ;;  %v330_v40 = vpop.eup %329  ;;  %v185_v42 = vmul.f32 0.5, %v184_v30  ;;  %v174_v50 = vmul.f32 %v328_v34, %v173_v43  ;;  %vm180_vm2 = vmor %vm178_vm10, %vm179_vm14 }
  0x9a   :  { %v197_v41 = vmul.f32 %v324_v2, %v196_v7  ;;  %v332_v46 = vpop.eup %331  ;;  %v223_v47 = vmul.f32 %v330_v40, %v551_v5  ;;  %vm229_vm15 = vweird.f32 %v330_v40  ;;  %v622_v0 = vmul.f32 %v482_v54, %v79_v39 }
  0x9b   :  { %335 = vrsqrt.f32 %v596_v11  ;;  %v186_v49 = vsub.f32 1.5, %v185_v42  ;;  %v213_v51 = vmul.f32 %v332_v46, %v554_v8  ;;  %v175_v55 = vmul.f32 0.5, %v174_v50  ;;  %vm230_vm4 = vmor %vm228_vm11, %vm229_vm15 }
  0x9c   :  { %v201_v48 = vsel %vm200_vm8, %v324_v2, %v197_v41  ;;  %v224_v53 = vmul.f32 %v330_v40, %v223_v47  ;;  %337 = vrsqrt.f32 %v599_v35  ;;  %vm219_vm1 = vweird.f32 %v332_v46 }
  0x9d   :  { %v280_v52 = vmul.f32 %v201_v48, %v405_v18  ;;  %v187_v32 = vmul.f32 %v326_v22, %v186_v49  ;;  %v214_v56 = vmul.f32 %v332_v46, %v213_v51  ;;  %v334_v57 = vpop.eup %333  ;;  %v176_v1 = vsub.f32 1.5, %v175_v55  ;;  %vm220_vm5 = vmor %vm218_vm12, %vm219_vm1 }
  0x9e   :  { %v225_v18 = vmul.f32 0.5, %v224_v53  ;;  %v203_v61 = vmul.f32 %v334_v57, %v583_v6  ;;  %339 = vrsqrt.f32 %v622_v0  ;;  %vm209_vm6 = vweird.f32 %v334_v57 }
  0x9f   :  { %296 = vst.msk [vmem:[%s699_s1 + $0x40] sm:$0xff] %vm40_vm0, %v280_v52  ;;  %v191_v58 = vsel %vm190_vm13, %v326_v22, %v187_v32  ;;  %v215_v59 = vmul.f32 0.5, %v214_v56  ;;  %v177_v9 = vmul.f32 %v328_v34, %v176_v1  ;;  %vm258_vm7 = vweird.f32 %v596_v11  ;;  %vm210_vm9 = vmor %vm208_vm3, %vm209_vm6 }
  0xa0   :  { %v279_v2 = vmul.f32 %v191_v58, %v410_v19  ;;  %v226_v63 = vsub.f32 1.5, %v225_v18  ;;  %v204_v13 = vmul.f32 %v334_v57, %v203_v61  ;;  %vm248_vm11 = vweird.f32 %v599_v35 }
  0xa1   :  { %v336_v62 = vpop.eup %335  ;;  %v88_v44 = vpop.xlane.xlu0 %87  ;;  %v216_v12 = vsub.f32 1.5, %v215_v59  ;;  %v181_v17 = vsel %vm180_vm2, %v328_v34, %v177_v9  ;;  %vm238_vm15 = vweird.f32 %v622_v0 }
  0xa2   :  { %v253_v14 = vmul.f32 %v336_v62, %v596_v11  ;;  %v338_v15 = vpop.eup %337  ;;  %295 = vst.msk [vmem:[%s699_s1 + $0x38] sm:$0xff] %vm40_vm0, %v279_v2  ;;  %v227_v19 = vmul.f32 %v330_v40, %v226_v63  ;;  %v637_v16 = vmul.f32 %v482_v54, %v88_v44  ;;  %v205_v22 = vmul.f32 0.5, %v204_v13 }
  0xa3   :  { %v217_v21 = vmul.f32 %v332_v46, %v216_v12  ;;  %v278_v23 = vmul.f32 %v181_v17, %v415_v20  ;;  %v243_v60 = vmul.f32 %v338_v15, %v599_v35  ;;  %vm259_vm8 = vweird.f32 %v336_v62 }
  0xa4   :  { %v254_v3 = vmul.f32 %v336_v62, %v253_v14  ;;  %v231_v10 = vsel %vm230_vm4, %v330_v40, %v227_v19  ;;  %v206_v25 = vsub.f32 1.5, %v205_v22  ;;  %v340_v5 = vpop.eup %339  ;;  %341 = vrsqrt.f32 %v637_v16  ;;  %vm260_vm10 = vmor %vm258_vm7, %vm259_vm8 }
  0xa5   :  { %v283_v54 = vmul.f32 %v231_v10, %v429_v27  ;;  %v221_v24 = vsel %vm220_vm5, %v332_v46, %v217_v21  ;;  %294 = vst.msk [vmem:[%s699_s1 + $0x30] sm:$0xff] %vm40_vm0, %v278_v23  ;;  %v244_v8 = vmul.f32 %v338_v15, %v243_v60  ;;  %v233_v7 = vmul.f32 %v340_v5, %v622_v0 }
  0xa6   :  { %v255_v4 = vmul.f32 0.5, %v254_v3  ;;  %v282_v20 = vmul.f32 %v221_v24, %v434_v28  ;;  %v207_v27 = vmul.f32 %v334_v57, %v206_v25  ;;  %vm249_vm12 = vweird.f32 %v338_v15 }
  0xa7   :  { %299 = vst.msk [vmem:[%s699_s1 + $0x58] sm:$0xff] %vm40_vm0, %v283_v54  ;;  %v245_v28 = vmul.f32 0.5, %v244_v8  ;;  %v234_v33 = vmul.f32 %v340_v5, %v233_v7  ;;  %vm250_vm13 = vmor %vm248_vm11, %vm249_vm12  ;;  %vm239_vm14 = vweird.f32 %v340_v5  ;;  %vm268_vm3 = vweird.f32 %v637_v16 }
  0xa8   :  { %v256_v26 = vsub.f32 1.5, %v255_v4  ;;  %298 = vst.msk [vmem:[%s699_s1 + $0x50] sm:$0xff] %vm40_vm0, %v282_v20  ;;  %v211_v30 = vsel %vm210_vm9, %v334_v57, %v207_v27  ;;  %vm240_vm1 = vmor %vm238_vm15, %vm239_vm14 }
  0xa9   :  { %v281_v34 = vmul.f32 %v211_v30, %v439_v29  ;;  %v246_v39 = vsub.f32 1.5, %v245_v28  ;;  %v235_v41 = vmul.f32 0.5, %v234_v33 }
  0xaa   :  { %v257_v31 = vmul.f32 %v336_v62, %v256_v26  ;;  %v342_v42 = vpop.eup %341 }
  0xab   :  { %297 = vst.msk [vmem:[%s699_s1 + $0x48] sm:$0xff] %vm40_vm0, %v281_v34  ;;  %v247_v43 = vmul.f32 %v338_v15, %v246_v39  ;;  %v236_v29 = vsub.f32 1.5, %v235_v41  ;;  %v263_v11 = vmul.f32 %v342_v42, %v637_v16  ;;  %vm269_vm2 = vweird.f32 %v342_v42 }
  0xac   :  { %v261_v40 = vsel %vm260_vm10, %v336_v62, %v257_v31  ;;  %vm270_vm4 = vmor %vm268_vm3, %vm269_vm2 }
  0xad   :  { %v286_v6 = vmul.f32 %v261_v40, %v453_v36  ;;  %v251_v35 = vsel %vm250_vm13, %v338_v15, %v247_v43  ;;  %v237_v47 = vmul.f32 %v340_v5, %v236_v29  ;;  %v264_v48 = vmul.f32 %v342_v42, %v263_v11 }
  0xae   :  { %v285_v46 = vmul.f32 %v251_v35, %v458_v37 }
  0xaf   :  { %302 = vst.msk [vmem:[%s699_s1 + $0x70] sm:$0xff] %vm40_vm0, %v286_v6  ;;  %v241_v36 = vsel %vm240_vm1, %v340_v5, %v237_v47  ;;  %v265_v49 = vmul.f32 0.5, %v264_v48 }
  0xb0   :  { %301 = vst.msk [vmem:[%s699_s1 + $0x68] sm:$0xff] %vm40_vm0, %v285_v46  ;;  %v284_v50 = vmul.f32 %v241_v36, %v463_v38 }
  0xb1   :  { %v266_v51 = vsub.f32 1.5, %v265_v49 }
  0xb2   :  { %300 = vst.msk [vmem:[%s699_s1 + $0x60] sm:$0xff] %vm40_vm0, %v284_v50 }
  0xb3   :  { %v267_v37 = vmul.f32 %v342_v42, %v266_v51 }
  0xb5   :  { %v271_v52 = vsel %vm270_vm4, %v342_v42, %v267_v37 }
  0xb6   :  { %v287_v53 = vmul.f32 %v271_v52, %v477_v45 }
  0xb8   :  { %303 = vst.msk [vmem:[%s699_s1 + $0x78] sm:$0xff] %vm40_vm0, %v287_v53 }

</bundles_post_ra>
